<compile_context>
chip_gen: v6e
topology: v6e:2x2x1
jax: 0.10.0
libtpu: 0.0.40
codegen_flags: <defaults>
</compile_context>

<pallas_src>
import jax
import jax.numpy as jnp
from jax.experimental import pallas as pl
from jax.experimental.pallas import tpu as pltpu

NEG_SLOPE = 0.01   # nn.LeakyReLU() default negative_slope
SUBLANE = 8        # f32 sublane count


def _round_up(x, m):
    return ((x + m - 1) // m) * m


# ---------------------------------------------------------------------------
# Fused kernel: chains all Linear+LeakyReLU layers over one batch tile.
# All weights/biases live fully in VMEM; intermediates never leave vregs/VMEM.
# ---------------------------------------------------------------------------
def _make_fused_mlp_kernel(num_layers):
    def kernel(x_ref, *refs):
        o_ref = refs[-1]
        h = x_ref[...]                                   # (tile_m, in_f), bf16
        for i in range(num_layers):
            w = refs[2 * i][...]                         # (in_f_i, out_f_i), bf16
            b = refs[2 * i + 1][...]                     # (1, out_f_i), f32
            # bf16 x bf16 on the MXU, f32 accumulation; f32 bias add.
            y = jnp.dot(h, w, preferred_element_type=jnp.float32) + b
            y = jnp.maximum(y, NEG_SLOPE * y)            # LeakyReLU (after EVERY layer)
            # Next layer consumes bf16 (MXU path); final layer output stays f32.
            h = y.astype(jnp.bfloat16) if i + 1 < num_layers else y
        o_ref[...] = h.astype(o_ref.dtype)
    return kernel


# ---------------------------------------------------------------------------
# Parameter construction (matches nn.Linear shapes; stored as (in, out)).
# ---------------------------------------------------------------------------
def init_dense_model_params(key, input_size, hidden_layers, output_size,
                            dtype=jnp.float32):
    all_sizes = [input_size] + list(hidden_layers) + [output_size]
    params = []
    for i in range(len(all_sizes) - 1):
        fan_in, fan_out = all_sizes[i], all_sizes[i + 1]
        key, kw, kb = jax.random.split(key, 3)
        bound = 1.0 / (fan_in ** 0.5)  # same range as torch's default Linear init
        w = jax.random.uniform(kw, (fan_in, fan_out), dtype, -bound, bound)
        b = jax.random.uniform(kb, (fan_out,), dtype, -bound, bound)
        params.append((w, b))
    return params


def prepare_params_for_kernel(params):
    """Weights -> bf16 (MXU operands), biases -> (1, out_f) f32. NO padding."""
    prepared = []
    for w, b in params:
        prepared.append((w.astype(jnp.bfloat16),
                         b.reshape(1, -1).astype(jnp.float32)))
    return prepared


# ---------------------------------------------------------------------------
# Batch tiling: rows per grid step and number of grid steps.
# ---------------------------------------------------------------------------
def _pick_batch_tiling(batch):
    # Small/moderate batches: one grid step covering the whole batch (full-dim block is
    # always legal; nothing worth splitting across a second TensorCore anyway).
    if batch <= 256:
        return batch, 1
    # Larger batches: an even number of steps (v7x has 2 TCs) with <=~1024-row tiles
    # (85%+ of HBM roofline, amortizes the ~0.35us/step overhead, tiny VMEM footprint).
    # Interior tiles are 8-row aligned; the last tile may be partial (masked), never
    # padded in HBM.
    steps = max(2, 2 * pl.cdiv(batch, 2048))
    tile_m = _round_up(pl.cdiv(batch, steps), SUBLANE)
    return tile_m, pl.cdiv(batch, tile_m)


# ---------------------------------------------------------------------------
# Forward pass: one pallas_call for the whole network.
# ---------------------------------------------------------------------------
def dense_model_forward(prepared_params, x):
    batch, in_features = x.shape
    num_layers = len(prepared_params)
    out_features = prepared_params[-1][0].shape[1]

    tile_m, num_steps = _pick_batch_tiling(batch)

    # Stream bf16 activations (halves input DMA of a mem-bound kernel). The cast is
    # fused into the Mosaic call via allow_input_fusion, so no extra HBM copy of x.
    x_bf16 = x.astype(jnp.bfloat16)

    in_specs = [pl.BlockSpec((tile_m, in_features), lambda i: (i, 0))]
    flat_inputs = [x_bf16]
    for w, b in prepared_params:
        in_specs.append(pl.BlockSpec(w.shape, lambda i: (0, 0)))   # full weight, VMEM-resident
        in_specs.append(pl.BlockSpec(b.shape, lambda i: (0, 0)))   # full bias, VMEM-resident
        flat_inputs.extend([w, b])

    return pl.pallas_call(
        _make_fused_mlp_kernel(num_layers),
        out_shape=jax.ShapeDtypeStruct((batch, out_features), jnp.float32),
        grid=(num_steps,),
        in_specs=in_specs,
        out_specs=pl.BlockSpec((tile_m, out_features), lambda i: (i, 0)),
        compiler_params=pltpu.CompilerParams(
            dimension_semantics=("parallel",),            # batch tiles -> both TCs on v7x
            vmem_limit_bytes=32 * 1024 * 1024,            # explicit (v5e default is 16 MiB)
            allow_input_fusion=[True] + [False] * (2 * num_layers),
        ),
    )(*flat_inputs)


# ---------------------------------------------------------------------------
# Pure-JAX reference with the SAME numerics (bf16 MXU operands, f32 accumulation).
# ---------------------------------------------------------------------------
def _reference_forward(params, x):
    h = x.astype(jnp.bfloat16)
    y = None
    for w, b in params:
        y = jnp.dot(h, w.astype(jnp.bfloat16),
                    preferred_element_type=jnp.float32) + b.astype(jnp.float32)
        y = jnp.maximum(y, NEG_SLOPE * y)
        h = y.astype(jnp.bfloat16)
    return y


if __name__ == "__main__":
    input_size = 16
    hidden_layers = [32, 64]
    output_size = 8
    batch = 4

    key = jax.random.PRNGKey(0)
    kx, kp = jax.random.split(key)
    x = jax.random.normal(kx, (batch, input_size), jnp.float32)

    params = init_dense_model_params(kp, input_size, hidden_layers, output_size)
    prepared = prepare_params_for_kernel(params)

    fwd = jax.jit(dense_model_forward)
    y = fwd(prepared, x)
    jax.block_until_ready(y)

    y_ref = _reference_forward(params, x)
    assert y.shape == (batch, output_size), y.shape
    assert jnp.allclose(y, y_ref, atol=1e-4, rtol=1e-4), \
        float(jnp.max(jnp.abs(y - y_ref)))
    print("KERNEL_OK")
</pallas_src>

<mosaic_0001>
module attributes {stable_mosaic.version = 11 : i64} {
  func.func @kernel(%arg0: i32, %arg1: memref<4x16xbf16, #tpu.memory_space<vmem>>, %arg2: memref<16x32xbf16, #tpu.memory_space<vmem>>, %arg3: memref<1x32xf32, #tpu.memory_space<vmem>>, %arg4: memref<32x64xbf16, #tpu.memory_space<vmem>>, %arg5: memref<1x64xf32, #tpu.memory_space<vmem>>, %arg6: memref<64x8xbf16, #tpu.memory_space<vmem>>, %arg7: memref<1x8xf32, #tpu.memory_space<vmem>>, %arg8: memref<4x8xf32, #tpu.memory_space<vmem>>) attributes {dimension_semantics = [#tpu.dimension_semantics<parallel>], iteration_bounds = array<i64: 1>, scalar_prefetch = 0 : i64, scratch_operands = 0 : i64, tpu.core_type = #tpu.core_type<tc>, window_params = [{transform_indices = @transform_0, window_bounds = array<i64: 4, 16>}, {pipeline_mode = #tpu.pipeline_mode<synchronous>, transform_indices = @transform_1, window_bounds = array<i64: 16, 32>}, {pipeline_mode = #tpu.pipeline_mode<synchronous>, transform_indices = @transform_2, window_bounds = array<i64: 1, 32>}, {pipeline_mode = #tpu.pipeline_mode<synchronous>, transform_indices = @transform_3, window_bounds = array<i64: 32, 64>}, {pipeline_mode = #tpu.pipeline_mode<synchronous>, transform_indices = @transform_4, window_bounds = array<i64: 1, 64>}, {pipeline_mode = #tpu.pipeline_mode<synchronous>, transform_indices = @transform_5, window_bounds = array<i64: 64, 8>}, {pipeline_mode = #tpu.pipeline_mode<synchronous>, transform_indices = @transform_6, window_bounds = array<i64: 1, 8>}, {transform_indices = @transform_7, window_bounds = array<i64: 4, 8>}]} {
    %c0 = arith.constant 0 : index
    %c0_0 = arith.constant 0 : index
    %0 = vector.load %arg1[%c0, %c0_0] : memref<4x16xbf16, #tpu.memory_space<vmem>>, vector<4x16xbf16>
    %c0_1 = arith.constant 0 : index
    %c0_2 = arith.constant 0 : index
    %1 = vector.load %arg2[%c0_1, %c0_2] : memref<16x32xbf16, #tpu.memory_space<vmem>>, vector<16x32xbf16>
    %c0_3 = arith.constant 0 : index
    %c0_4 = arith.constant 0 : index
    %2 = vector.load %arg3[%c0_3, %c0_4] : memref<1x32xf32, #tpu.memory_space<vmem>>, vector<1x32xf32>
    %cst = arith.constant dense<0.000000e+00> : vector<4x32xf32>
    %3 = tpu.matmul %0, %1, %cst {dimension_numbers = #tpu.dot_dimension_numbers<[1], [0], [0], [1], [0, 0, 1, 1], [], []>} : vector<4x16xbf16>, vector<16x32xbf16>, vector<4x32xf32> -> vector<4x32xf32>
    %4 = vector.broadcast %2 : vector<1x32xf32> to vector<4x32xf32>
    %5 = arith.addf %3, %4 : vector<4x32xf32>
    %cst_5 = arith.constant 0.00999999977 : f32
    %6 = vector.broadcast %cst_5 : f32 to vector<4x32xf32>
    %7 = arith.mulf %6, %5 : vector<4x32xf32>
    %8 = arith.maximumf %5, %7 : vector<4x32xf32>
    %9 = arith.truncf %8 : vector<4x32xf32> to vector<4x32xbf16>
    %c0_6 = arith.constant 0 : index
    %c0_7 = arith.constant 0 : index
    %10 = vector.load %arg4[%c0_6, %c0_7] : memref<32x64xbf16, #tpu.memory_space<vmem>>, vector<32x64xbf16>
    %c0_8 = arith.constant 0 : index
    %c0_9 = arith.constant 0 : index
    %11 = vector.load %arg5[%c0_8, %c0_9] : memref<1x64xf32, #tpu.memory_space<vmem>>, vector<1x64xf32>
    %cst_10 = arith.constant dense<0.000000e+00> : vector<4x64xf32>
    %12 = tpu.matmul %9, %10, %cst_10 {dimension_numbers = #tpu.dot_dimension_numbers<[1], [0], [0], [1], [0, 0, 1, 1], [], []>} : vector<4x32xbf16>, vector<32x64xbf16>, vector<4x64xf32> -> vector<4x64xf32>
    %13 = vector.broadcast %11 : vector<1x64xf32> to vector<4x64xf32>
    %14 = arith.addf %12, %13 : vector<4x64xf32>
    %cst_11 = arith.constant 0.00999999977 : f32
    %15 = vector.broadcast %cst_11 : f32 to vector<4x64xf32>
    %16 = arith.mulf %15, %14 : vector<4x64xf32>
    %17 = arith.maximumf %14, %16 : vector<4x64xf32>
    %18 = arith.truncf %17 : vector<4x64xf32> to vector<4x64xbf16>
    %c0_12 = arith.constant 0 : index
    %c0_13 = arith.constant 0 : index
    %19 = vector.load %arg6[%c0_12, %c0_13] : memref<64x8xbf16, #tpu.memory_space<vmem>>, vector<64x8xbf16>
    %c0_14 = arith.constant 0 : index
    %c0_15 = arith.constant 0 : index
    %20 = vector.load %arg7[%c0_14, %c0_15] : memref<1x8xf32, #tpu.memory_space<vmem>>, vector<1x8xf32>
    %cst_16 = arith.constant dense<0.000000e+00> : vector<4x8xf32>
    %21 = tpu.matmul %18, %19, %cst_16 {dimension_numbers = #tpu.dot_dimension_numbers<[1], [0], [0], [1], [0, 0, 1, 1], [], []>} : vector<4x64xbf16>, vector<64x8xbf16>, vector<4x8xf32> -> vector<4x8xf32>
    %22 = vector.broadcast %20 : vector<1x8xf32> to vector<4x8xf32>
    %23 = arith.addf %21, %22 : vector<4x8xf32>
    %cst_17 = arith.constant 0.00999999977 : f32
    %24 = vector.broadcast %cst_17 : f32 to vector<4x8xf32>
    %25 = arith.mulf %24, %23 : vector<4x8xf32>
    %26 = arith.maximumf %23, %25 : vector<4x8xf32>
    %c0_18 = arith.constant 0 : index
    %c0_19 = arith.constant 0 : index
    %27 = vector.load %arg8[%c0_18, %c0_19] : memref<4x8xf32, #tpu.memory_space<vmem>>, vector<4x8xf32>
    tpu.vector_store %arg8[%c0_18, %c0_19], %26 {strides = array<i32>} : memref<4x8xf32, #tpu.memory_space<vmem>>, vector<4x8xf32>,
    return
  }
  func.func @transform_0(%arg0: i32) -> (i32, i32) {
    %c0_i32 = arith.constant 0 : i32
    %c0_i32_0 = arith.constant 0 : i32
    return %arg0, %c0_i32 : i32, i32
  }
  func.func @transform_1(%arg0: i32) -> (i32, i32) {
    %c0_i32 = arith.constant 0 : i32
    %c0_i32_0 = arith.constant 0 : i32
    %c0_i32_1 = arith.constant 0 : i32
    return %c0_i32, %c0_i32_0 : i32, i32
  }
  func.func @transform_2(%arg0: i32) -> (i32, i32) {
    %c0_i32 = arith.constant 0 : i32
    %c0_i32_0 = arith.constant 0 : i32
    %c0_i32_1 = arith.constant 0 : i32
    return %c0_i32, %c0_i32_0 : i32, i32
  }
  func.func @transform_3(%arg0: i32) -> (i32, i32) {
    %c0_i32 = arith.constant 0 : i32
    %c0_i32_0 = arith.constant 0 : i32
    %c0_i32_1 = arith.constant 0 : i32
    return %c0_i32, %c0_i32_0 : i32, i32
  }
  func.func @transform_4(%arg0: i32) -> (i32, i32) {
    %c0_i32 = arith.constant 0 : i32
    %c0_i32_0 = arith.constant 0 : i32
    %c0_i32_1 = arith.constant 0 : i32
    return %c0_i32, %c0_i32_0 : i32, i32
  }
  func.func @transform_5(%arg0: i32) -> (i32, i32) {
    %c0_i32 = arith.constant 0 : i32
    %c0_i32_0 = arith.constant 0 : i32
    %c0_i32_1 = arith.constant 0 : i32
    return %c0_i32, %c0_i32_0 : i32, i32
  }
  func.func @transform_6(%arg0: i32) -> (i32, i32) {
    %c0_i32 = arith.constant 0 : i32
    %c0_i32_0 = arith.constant 0 : i32
    %c0_i32_1 = arith.constant 0 : i32
    return %c0_i32, %c0_i32_0 : i32, i32
  }
  func.func @transform_7(%arg0: i32) -> (i32, i32) {
    %c0_i32 = arith.constant 0 : i32
    %c0_i32_0 = arith.constant 0 : i32
    return %arg0, %c0_i32 : i32, i32
  }
}

</mosaic_0001>

<bundles_post_ra>
// kernel: dense_model_forward.2
= control target key start
LH: loop header
LB: loop body
LE: loop exit
PB: predicated region body
PF: predicated region fallthrough
CT: control target
= control target key end

     0   :  { %v351_v1 = vmov 0.0   ;;  %vm352_vm0 = vmmov 0   ;;  %s430_s0 = inlined_call_operand.vmem [shape: bf16[16,32], index: 0, kind: input, shape index: {}]   ;;  %s431_s1 = inlined_call_operand.vmem [shape: f32[1,32], index: 1, kind: input, shape index: {}]   ;;  %s432_s2 = inlined_call_operand.vmem [shape: bf16[32,64], index: 2, kind: input, shape index: {}]   ;;  %s433_s3 = inlined_call_operand.vmem [shape: f32[1,64], index: 3, kind: input, shape index: {}]   ;;  %s434_s4 = inlined_call_operand.vmem [shape: bf16[64,8], index: 4, kind: input, shape index: {}]   ;;  %s435_s5 = inlined_call_operand.vmem [shape: f32[1,8], index: 5, kind: input, shape index: {}]   ;;  %s436_s6 = inlined_call_operand.vmem [shape: f32[4,16], index: 6, kind: input, shape index: {}]   ;;  %s437_s7 = inlined_call_operand.hbm [shape: f32[4,8], index: 7, kind: output, shape index: {}]  }
   0x1   :  { %v322_v0 = vld [vmem:[%s430_s0] sm:$0xff]   ;;  %293 = vmatprep.subr.bf16.mxu1 %v351_v1  ;;  %307 = vmatprep.subr.bf16.mxu0 %v351_v1 }
   0x2   :  { %v27_v2 = vld [vmem:[%s436_s6] sm:$0xf]  ;;  %294 = vmatpush3.bf16.msra.mxu1 %v322_v0  ;;  %295 = vmatprep.mubr.msk.bf16.mxu1 %vm352_vm0, %v351_v1 }
   0x3   :  { %v31_v3 = vpack.c.bf16 %v351_v1, %v27_v2  ;;  %299 = vmatprep.subr.bf16.mxu1 %v351_v1  ;;  %315 = vmatprep.mubr.msk.bf16.mxu0 %vm352_vm0, %v351_v1 }
   0x5   :  { %34 = vst [vmem:[#allocation4] sm:$0x3] %v31_v3 }
   0x6   :  { %12 = vsyncpa [#allocation3], 0  ;;  %vm52_vm1 = vcmask 130048   ;;  %v323_v5 = vld [vmem:[%s432_s2 + $0x8] sm:$0xff]   ;;  %v324_v6 = vld [vmem:[%s432_s2] sm:$0xff]   ;;  %vm122_vm2 = vcmask 261120  }
   0x7   :  { %v325_v7 = vld [vmem:[%s434_s4 + $0x18] sm:$0xff]   ;;  %v326_v8 = vld [vmem:[%s434_s4 + $0x10] sm:$0xff]   ;;  %v270_v9 = vld [vmem:[%s431_s1] ss:$0 sm:$0xff]  ;;  %vm208_vm3 = vcmask 523264   ;;  %vm254_vm4 = vcmask 60416  }
   0x8   :  { %308 = vmatpush3.bf16.msra.mxu0 %v325_v7  ;;  %v327_v18 = vld [vmem:[%s434_s4 + $0x8] sm:$0xff]   ;;  %v328_v19 = vld [vmem:[%s434_s4] sm:$0xff]   ;;  %s353_s4 = smov [#allocation2]  }
   0x9   :  { %309 = vmatprep.subr.bf16.mxu0 %v351_v1  ;;  %v273_v20 = vld [vmem:[%s433_s3] ss:$0 sm:$0xff]  ;;  %s262_s19 = sshll.u32 %s353_s4, 4  ;;  %s263_s19 = int_to_ptr.vmem [resolvable:$true] %s262_s19 }
   0xa   :  { %v277_v29 = vld [vmem:[%s435_s5] ss:$0 sm:$0xff]  ;;  %s329_s3 = scalar_lea.vmem %s263_s19, 64  ;;  %p334_p1 = scmp.lt.s32.totalorder %s263_s19, %s263_s19 }
   0xb   :  { %p330_p0 = scmp.ne.s32.totalorder %s263_s19, %s329_s3  ;;  %p335_p2 = scmp.lt.s32.totalorder %s329_s3, %s329_s3 }
   0xc   :  { %v36_v4 = vld [vmem:[#allocation4] sm:$0x3]  ;;  %310 = vmatpush3.bf16.msra.mxu0 %v326_v8 }
   0xd   :  { %296 = vmatmul.mubr.msk.bf16.vlgmr.msra.gmra.mxu1 %vm52_vm1, %v36_v4  ;;  %311 = vmatprep.subr.bf16.mxu0 %v351_v1  ;;  %p336_p3 = por %p335_p2, %p334_p1 }
   0xe   :  { %303 = vmatprep.mubr.msk.bf16.mxu1 %vm352_vm0, %v351_v1  ;;  %300 = vmatpush3.bf16.msra.mxu1 %v323_v5 }
   0xf   :  { %301 = vmatprep.subr.bf16.mxu1 %v351_v1  ;;  %p337_p4 = pnand %p336_p3, %p330_p0 }
  0x10   :  { %312 = vmatpush3.bf16.msra.mxu0 %v327_v18 }
  0x11   :  { %313 = vmatprep.subr.bf16.mxu0 %v351_v1 }
  0x12   :  { %302 = vmatpush3.bf16.msra.mxu1 %v324_v6 }
  0x14   :  { %314 = vmatpush3.bf16.msra.mxu0 %v328_v19 }
  0xcd   :  { %v90_v10 = vpop.f32.mrf.mxu1 }
  0xce   :  { %v91_v11 = vadd.f32 %v270_v9, %v90_v10 }
  0xcf   :  { %v297_v12 = vpop.f32.mrf.mxu1 }
  0xd0   :  { %v96_v13 = vmul.f32 0.01, %v91_v11 }
  0xd1   :  { %v93_v14 = vpop.f32.mrf.mxu1 }
  0xd2   :  { %v97_v15 = vmax.f32 %v91_v11, %v96_v13 }
  0xd3   :  { %v298_v16 = vpop.f32.mrf.mxu1 }
  0xd4   :  { %v98_v17 = vpack.c.bf16 %v97_v15, %v97_v15 }
  0xd6   :  { %304 = vmatmul.mubr.msk.bf16.vlgmr.msra.gmra.mxu1 %vm122_vm2, %v98_v17 }
 0x196   :  { %v160_v21 = vpop.f32.mrf.mxu1 }
 0x197   :  { %v161_v22 = vadd.f32 %v273_v20, %v160_v21 }
 0x198   :  { %v305_v23 = vpop.f32.mrf.mxu1 }
 0x199   :  { %v166_v24 = vmul.f32 0.01, %v161_v22 }
 0x19a   :  { %v163_v25 = vpop.f32.mrf.mxu1 }
 0x19b   :  { %v167_v26 = vmax.f32 %v161_v22, %v166_v24 }
 0x19c   :  { %v306_v27 = vpop.f32.mrf.mxu1 }
 0x19d   :  { %v168_v28 = vpack.c.bf16 %v167_v26, %v167_v26 }
 0x19f   :  { %316 = vmatmul.mubr.msk.bf16.vlgmr.msra.gmra.mxu0 %vm208_vm3, %v168_v28 }
 0x25f   :  { %v246_v30 = vpop.f32.mrf.mxu0 }
 0x260   :  { %v247_v31 = vadd.f32 %v277_v29, %v246_v30 }
 0x261   :  { %v317_v32 = vpop.f32.mrf.mxu0 }
 0x262   :  { %v252_v33 = vmul.f32 0.01, %v247_v31 }
 0x263   :  { %v249_v34 = vpop.f32.mrf.mxu0 }
 0x264   :  { %v253_v35 = vmax.f32 %v247_v31, %v252_v33 }
 0x265   :  { %v318_v36 = vpop.f32.mrf.mxu0 }
 0x266   :  { %255 = vst.msk [vmem:[#allocation2] sm:$0xf] %vm254_vm4, %v253_v35 }
 0x267   :  { %340 = shalt.err (!%p337_p4)
}
 0x268   :  { %265 = dma.vmem_to_hbm [thread:$0]  %s263_s19, 64, %s437_s7, [#allocation3]  }
 0x269   :  { %349 = dma.done.wait [#allocation3], 64  }
 0x26a   :  { %350 = vsyncadd [#allocation3], 4294967232 }
 0x26b   :  { %269 = vsyncpa [#allocation3], 1 }

</bundles_post_ra>
